<compile_context>
chip_gen: v7x
topology: tpu7x:2x2x1
jax: 0.10.0
libtpu: 0.0.40
codegen_flags: <defaults>
</compile_context>

<pallas_src>
import functools

import numpy as np
import jax
import jax.numpy as jnp
from jax.experimental import pallas as pl
from jax.experimental.pallas import tpu as pltpu


def _round_up(n, m):
    return ((n + m - 1) // m) * m


# ----------------------------------------------------------------------------
# Pallas kernel: fused  x -> [ @W * scale + shift -> (ReLU) ] * n_layers -> y
# ----------------------------------------------------------------------------

def _mlp_fused_kernel(*refs, relu_flags):
    n_layers = len(relu_flags)
    x_ref, o_ref = refs[0], refs[-1]
    h = x_ref[...]                                       # (TM, Din) bf16
    for li in range(n_layers):
        w_ref, s_ref, t_ref = refs[1 + 3 * li: 4 + 3 * li]
        # bf16 x bf16 on the MXU, fp32 accumulation.
        acc = jnp.dot(h, w_ref[...], preferred_element_type=jnp.float32)
        # Linear bias + eval-mode BatchNorm folded into per-channel scale/shift.
        acc = acc * s_ref[...] + t_ref[...]
        if relu_flags[li]:
            acc = jnp.maximum(acc, 0.0)
        # Hidden activations stay bf16 in vregs/VMEM for the next MXU pass.
        h = acc.astype(jnp.bfloat16) if li < n_layers - 1 else acc
    o_ref[...] = h.astype(o_ref.dtype)


# ----------------------------------------------------------------------------
# VMEM budget / row-tile selection
# ----------------------------------------------------------------------------

def _vmem_budget_bytes():
    cap = 64 << 20
    try:
        info = pltpu.get_tpu_info()
        cap = int(getattr(info, "vmem_capacity_bytes", cap)) or cap
    except Exception:
        pass
    # Conservative cross-generation cap: v7x has only 64 MiB per TensorCore
    # (v5e/v6e have 128 MiB; at MLP widths this never binds anyway).
    cap = min(cap, 64 << 20)
    return max(16 << 20, cap - (16 << 20))     # headroom for compiler scratch


def _pick_row_tile(n, din, fused_params, out_bytes, budget):
    widths = [w.shape[1] for w, _, _ in fused_params]
    # Grid-invariant operands (weights / scale / shift); the pipeline still
    # double-buffers them, so count 2x.  (pl.Buffered(1) would halve this, but
    # the footprint is negligible at these sizes.)
    resident = sum(2 * (w.size * 2 + s.size * 4 + t.size * 4)
                   for w, s, t in fused_params)
    per_row = 2 * din * 2                      # double-buffered x tile (bf16)
    per_row += 2 * widths[-1] * out_bytes      # double-buffered out tile
    per_row += 4 * sum(widths)                 # fp32 intermediates / temporaries
    if resident + 8 * per_row > budget:
        # TODO(synk): K/N grid tiling for weights that exceed the VMEM budget.
        raise ValueError("MLP weights do not fit the VMEM budget; "
                         "K/N tiling is not implemented.")
    tm = 8
    for cand in (2048, 1024, 512, 256, 128, 64, 32, 16, 8):
        if resident + cand * per_row <= budget:
            tm = cand
            break
    tm = min(tm, _round_up(n, 8))
    # Keep >= 2 row blocks when there is enough work, so ("parallel",) can
    # shard the row grid across v7x's two TensorCores.
    if n >= 256:
        tm = min(tm, _round_up((n + 1) // 2, 128))
    return tm


# ----------------------------------------------------------------------------
# Parameter prep (fold bias + BN, lane-pad) and the fused forward
# ----------------------------------------------------------------------------

def prepare_mlp(params, last_layer_act='linear', eps=1e-5):
    """Fold Linear bias + eval-mode BN into (scale, shift) and lane-pad."""
    n_layers = len(params)
    fused, relu_flags = [], []
    prev_width = params[0]['w'].shape[0]            # true Din (x is not padded)
    for i, layer in enumerate(params):
        w = layer['w']
        din, dout = w.shape
        is_last = i == n_layers - 1
        dout_pad = dout if is_last else _round_up(dout, 128)

        b, bn = layer['b'], layer['bn']
        if bn is None:
            scale = jnp.ones((dout,), jnp.float32)
            shift = b.astype(jnp.float32)
        else:
            s = bn['gamma'] * jax.lax.rsqrt(bn['var'] + eps)
            scale = s
            shift = (b - bn['mean']) * s + bn['beta']

        # Zero-pad rows to the previous layer's padded width and (hidden-layer)
        # columns to 128-lane multiples.  Padding columns get scale=shift=0 so
        # they stay exactly zero through the ReLU chain.
        w = jnp.pad(w.astype(jnp.bfloat16),
                    ((0, prev_width - din), (0, dout_pad - dout)))
        scale = jnp.pad(scale, (0, dout_pad - dout)).reshape(1, dout_pad)
        shift = jnp.pad(shift, (0, dout_pad - dout)).reshape(1, dout_pad)

        fused.append((w, scale, shift))
        relu_flags.append((not is_last) or (last_layer_act == 'ReLU'))
        prev_width = dout_pad
    return fused, tuple(relu_flags)


def mlp_forward_fused(fused_params, x, *, relu_flags, out_dtype=jnp.float32):
    """Whole-MLP fused forward: one pallas_call, row-tiled grid."""
    n, din = x.shape
    dout = fused_params[-1][0].shape[1]
    x = x.astype(jnp.bfloat16)

    out_bytes = jnp.dtype(out_dtype).itemsize
    budget = _vmem_budget_bytes()
    tm = _pick_row_tile(n, din, fused_params, out_bytes, budget)
    grid = (pl.cdiv(n, tm),)

    in_specs = [pl.BlockSpec((tm, din), lambda i: (i, 0))]      # x: row-tiled
    flat_params = []
    flops = 0
    bytes_accessed = n * din * 2 + n * dout * out_bytes
    for (w, s, t) in fused_params:
        kp, npad = w.shape
        in_specs.append(pl.BlockSpec((kp, npad), lambda i: (0, 0)))   # weight
        in_specs.append(pl.BlockSpec((1, npad), lambda i: (0, 0)))    # scale
        in_specs.append(pl.BlockSpec((1, npad), lambda i: (0, 0)))    # shift
        flat_params += [w, s, t]
        flops += 2 * n * kp * npad
        bytes_accessed += w.size * 2 + s.size * 4 + t.size * 4

    out = pl.pallas_call(
        functools.partial(_mlp_fused_kernel, relu_flags=relu_flags),
        out_shape=jax.ShapeDtypeStruct((n, dout), out_dtype),
        grid=grid,
        in_specs=in_specs,
        out_specs=pl.BlockSpec((tm, dout), lambda i: (i, 0)),
        compiler_params=pltpu.CompilerParams(
            dimension_semantics=("parallel",),
            vmem_limit_bytes=int(budget)),
        cost_estimate=pl.CostEstimate(
            flops=int(flops), transcendentals=0,
            bytes_accessed=int(bytes_accessed)),
    )(x, *flat_params)
    return out


# ----------------------------------------------------------------------------
# Deterministic torch-default-style init and a pure-JAX reference
# ----------------------------------------------------------------------------

def init_mlp_params(key, sizes, batch_norm=True):
    """Per layer: Linear(w, b) [+ BatchNorm1d(gamma, beta, mean, var)]."""
    layers = []
    n_layers = len(sizes) - 1
    keys = jax.random.split(key, 6 * n_layers)
    ki = iter(keys)
    for i in range(n_layers):
        din, dout = sizes[i], sizes[i + 1]
        lim = 1.0 / np.sqrt(din)
        w = jax.random.uniform(next(ki), (din, dout), jnp.float32, -lim, lim)
        b = jax.random.uniform(next(ki), (dout,), jnp.float32, -lim, lim)
        layer = {'w': w, 'b': b}
        if batch_norm and i < n_layers - 1:
            layer['bn'] = {
                'gamma': 1.0 + 0.1 * jax.random.normal(next(ki), (dout,), jnp.float32),
                'beta': 0.1 * jax.random.normal(next(ki), (dout,), jnp.float32),
                'mean': 0.1 * jax.random.normal(next(ki), (dout,), jnp.float32),
                'var': 0.5 + jax.nn.softplus(
                    jax.random.normal(next(ki), (dout,), jnp.float32)),
            }
        else:
            layer['bn'] = None
        layers.append(layer)
    return layers


def mlp_reference(fused_params, x, relu_flags):
    """Plain-jnp emulation of the fused kernel for correctness checking."""
    n_layers = len(fused_params)
    h = x.astype(jnp.bfloat16)
    for li, (w, scale, shift) in enumerate(fused_params):
        acc = jnp.dot(h, w, preferred_element_type=jnp.float32) * scale + shift
        if relu_flags[li]:
            acc = jnp.maximum(acc, 0.0)
        h = acc.astype(jnp.bfloat16) if li < n_layers - 1 else acc
    return h.astype(jnp.float32)


# ----------------------------------------------------------------------------
# Main
# ----------------------------------------------------------------------------

if __name__ == "__main__":
    sizes = (32, 64, 64, 16)     # MLP(sizes, batch_norm=True, last='linear')
    batch = 16

    key = jax.random.PRNGKey(0)
    kparam, kx = jax.random.split(key)
    params = init_mlp_params(kparam, sizes, batch_norm=True)
    x = jax.random.normal(kx, (batch, sizes[0]), jnp.float32)

    # One-time parameter prep (bias+BN folding, lane padding, bf16 cast).
    fused_params, relu_flags = prepare_mlp(params, last_layer_act='linear')

    fwd = jax.jit(functools.partial(mlp_forward_fused, relu_flags=relu_flags))
    out = jax.block_until_ready(fwd(fused_params, x))

    ref = mlp_reference(fused_params, x, relu_flags)

    assert out.shape == (batch, sizes[-1])
    assert bool(jnp.all(jnp.isfinite(out)))
    assert bool(jnp.allclose(out, ref, rtol=5e-2, atol=5e-2))
    print("KERNEL_OK")
</pallas_src>

<mosaic_0001>
module attributes {stable_mosaic.version = 11 : i64} {
  func.func @_mlp_fused_kernel(%arg0: i32, %arg1: memref<16x32xbf16, #tpu.memory_space<vmem>>, %arg2: memref<32x128xbf16, #tpu.memory_space<vmem>>, %arg3: memref<1x128xf32, #tpu.memory_space<vmem>>, %arg4: memref<1x128xf32, #tpu.memory_space<vmem>>, %arg5: memref<128x128xbf16, #tpu.memory_space<vmem>>, %arg6: memref<1x128xf32, #tpu.memory_space<vmem>>, %arg7: memref<1x128xf32, #tpu.memory_space<vmem>>, %arg8: memref<128x16xbf16, #tpu.memory_space<vmem>>, %arg9: memref<1x16xf32, #tpu.memory_space<vmem>>, %arg10: memref<1x16xf32, #tpu.memory_space<vmem>>, %arg11: memref<16x16xf32, #tpu.memory_space<vmem>>) attributes {dimension_semantics = [#tpu.dimension_semantics<parallel>], iteration_bounds = array<i64: 1>, scalar_prefetch = 0 : i64, scratch_operands = 0 : i64, tpu.core_type = #tpu.core_type<tc>, window_params = [{transform_indices = @transform_0, window_bounds = array<i64: 16, 32>}, {pipeline_mode = #tpu.pipeline_mode<synchronous>, transform_indices = @transform_1, window_bounds = array<i64: 32, 128>}, {pipeline_mode = #tpu.pipeline_mode<synchronous>, transform_indices = @transform_2, window_bounds = array<i64: 1, 128>}, {pipeline_mode = #tpu.pipeline_mode<synchronous>, transform_indices = @transform_3, window_bounds = array<i64: 1, 128>}, {pipeline_mode = #tpu.pipeline_mode<synchronous>, transform_indices = @transform_4, window_bounds = array<i64: 128, 128>}, {pipeline_mode = #tpu.pipeline_mode<synchronous>, transform_indices = @transform_5, window_bounds = array<i64: 1, 128>}, {pipeline_mode = #tpu.pipeline_mode<synchronous>, transform_indices = @transform_6, window_bounds = array<i64: 1, 128>}, {pipeline_mode = #tpu.pipeline_mode<synchronous>, transform_indices = @transform_7, window_bounds = array<i64: 128, 16>}, {pipeline_mode = #tpu.pipeline_mode<synchronous>, transform_indices = @transform_8, window_bounds = array<i64: 1, 16>}, {pipeline_mode = #tpu.pipeline_mode<synchronous>, transform_indices = @transform_9, window_bounds = array<i64: 1, 16>}, {transform_indices = @transform_10, window_bounds = array<i64: 16, 16>}]} {
    %c0 = arith.constant 0 : index
    %c0_0 = arith.constant 0 : index
    %0 = vector.load %arg1[%c0, %c0_0] : memref<16x32xbf16, #tpu.memory_space<vmem>>, vector<16x32xbf16>
    %c0_1 = arith.constant 0 : index
    %c0_2 = arith.constant 0 : index
    %1 = vector.load %arg2[%c0_1, %c0_2] : memref<32x128xbf16, #tpu.memory_space<vmem>>, vector<32x128xbf16>
    %cst = arith.constant dense<0.000000e+00> : vector<16x128xf32>
    %2 = tpu.matmul %0, %1, %cst {dimension_numbers = #tpu.dot_dimension_numbers<[1], [0], [0], [1], [0, 0, 1, 1], [], []>} : vector<16x32xbf16>, vector<32x128xbf16>, vector<16x128xf32> -> vector<16x128xf32>
    %c0_3 = arith.constant 0 : index
    %c0_4 = arith.constant 0 : index
    %3 = vector.load %arg3[%c0_3, %c0_4] : memref<1x128xf32, #tpu.memory_space<vmem>>, vector<1x128xf32>
    %4 = vector.broadcast %3 : vector<1x128xf32> to vector<16x128xf32>
    %5 = arith.mulf %2, %4 : vector<16x128xf32>
    %c0_5 = arith.constant 0 : index
    %c0_6 = arith.constant 0 : index
    %6 = vector.load %arg4[%c0_5, %c0_6] : memref<1x128xf32, #tpu.memory_space<vmem>>, vector<1x128xf32>
    %7 = vector.broadcast %6 : vector<1x128xf32> to vector<16x128xf32>
    %8 = arith.addf %5, %7 : vector<16x128xf32>
    %cst_7 = arith.constant 0.000000e+00 : f32
    %9 = vector.broadcast %cst_7 : f32 to vector<16x128xf32>
    %10 = arith.maximumf %8, %9 : vector<16x128xf32>
    %11 = arith.truncf %10 : vector<16x128xf32> to vector<16x128xbf16>
    %c0_8 = arith.constant 0 : index
    %c0_9 = arith.constant 0 : index
    %12 = vector.load %arg5[%c0_8, %c0_9] : memref<128x128xbf16, #tpu.memory_space<vmem>>, vector<128x128xbf16>
    %cst_10 = arith.constant dense<0.000000e+00> : vector<16x128xf32>
    %13 = tpu.matmul %11, %12, %cst_10 {dimension_numbers = #tpu.dot_dimension_numbers<[1], [0], [0], [1], [0, 0, 1, 1], [], []>} : vector<16x128xbf16>, vector<128x128xbf16>, vector<16x128xf32> -> vector<16x128xf32>
    %c0_11 = arith.constant 0 : index
    %c0_12 = arith.constant 0 : index
    %14 = vector.load %arg6[%c0_11, %c0_12] : memref<1x128xf32, #tpu.memory_space<vmem>>, vector<1x128xf32>
    %15 = vector.broadcast %14 : vector<1x128xf32> to vector<16x128xf32>
    %16 = arith.mulf %13, %15 : vector<16x128xf32>
    %c0_13 = arith.constant 0 : index
    %c0_14 = arith.constant 0 : index
    %17 = vector.load %arg7[%c0_13, %c0_14] : memref<1x128xf32, #tpu.memory_space<vmem>>, vector<1x128xf32>
    %18 = vector.broadcast %17 : vector<1x128xf32> to vector<16x128xf32>
    %19 = arith.addf %16, %18 : vector<16x128xf32>
    %cst_15 = arith.constant 0.000000e+00 : f32
    %20 = vector.broadcast %cst_15 : f32 to vector<16x128xf32>
    %21 = arith.maximumf %19, %20 : vector<16x128xf32>
    %22 = arith.truncf %21 : vector<16x128xf32> to vector<16x128xbf16>
    %c0_16 = arith.constant 0 : index
    %c0_17 = arith.constant 0 : index
    %23 = vector.load %arg8[%c0_16, %c0_17] : memref<128x16xbf16, #tpu.memory_space<vmem>>, vector<128x16xbf16>
    %cst_18 = arith.constant dense<0.000000e+00> : vector<16x16xf32>
    %24 = tpu.matmul %22, %23, %cst_18 {dimension_numbers = #tpu.dot_dimension_numbers<[1], [0], [0], [1], [0, 0, 1, 1], [], []>} : vector<16x128xbf16>, vector<128x16xbf16>, vector<16x16xf32> -> vector<16x16xf32>
    %c0_19 = arith.constant 0 : index
    %c0_20 = arith.constant 0 : index
    %25 = vector.load %arg9[%c0_19, %c0_20] : memref<1x16xf32, #tpu.memory_space<vmem>>, vector<1x16xf32>
    %26 = vector.broadcast %25 : vector<1x16xf32> to vector<16x16xf32>
    %27 = arith.mulf %24, %26 : vector<16x16xf32>
    %c0_21 = arith.constant 0 : index
    %c0_22 = arith.constant 0 : index
    %28 = vector.load %arg10[%c0_21, %c0_22] : memref<1x16xf32, #tpu.memory_space<vmem>>, vector<1x16xf32>
    %29 = vector.broadcast %28 : vector<1x16xf32> to vector<16x16xf32>
    %30 = arith.addf %27, %29 : vector<16x16xf32>
    %c0_23 = arith.constant 0 : index
    %c0_24 = arith.constant 0 : index
    %31 = vector.load %arg11[%c0_23, %c0_24] : memref<16x16xf32, #tpu.memory_space<vmem>>, vector<16x16xf32>
    tpu.vector_store %arg11[%c0_23, %c0_24], %30 {strides = array<i32>} : memref<16x16xf32, #tpu.memory_space<vmem>>, vector<16x16xf32>,
    return
  }
  func.func @transform_0(%arg0: i32) -> (i32, i32) {
    %c0_i32 = arith.constant 0 : i32
    %c0_i32_0 = arith.constant 0 : i32
    return %arg0, %c0_i32 : i32, i32
  }
  func.func @transform_1(%arg0: i32) -> (i32, i32) {
    %c0_i32 = arith.constant 0 : i32
    %c0_i32_0 = arith.constant 0 : i32
    %c0_i32_1 = arith.constant 0 : i32
    return %c0_i32, %c0_i32_0 : i32, i32
  }
  func.func @transform_2(%arg0: i32) -> (i32, i32) {
    %c0_i32 = arith.constant 0 : i32
    %c0_i32_0 = arith.constant 0 : i32
    %c0_i32_1 = arith.constant 0 : i32
    return %c0_i32, %c0_i32_0 : i32, i32
  }
  func.func @transform_3(%arg0: i32) -> (i32, i32) {
    %c0_i32 = arith.constant 0 : i32
    %c0_i32_0 = arith.constant 0 : i32
    %c0_i32_1 = arith.constant 0 : i32
    return %c0_i32, %c0_i32_0 : i32, i32
  }
  func.func @transform_4(%arg0: i32) -> (i32, i32) {
    %c0_i32 = arith.constant 0 : i32
    %c0_i32_0 = arith.constant 0 : i32
    %c0_i32_1 = arith.constant 0 : i32
    return %c0_i32, %c0_i32_0 : i32, i32
  }
  func.func @transform_5(%arg0: i32) -> (i32, i32) {
    %c0_i32 = arith.constant 0 : i32
    %c0_i32_0 = arith.constant 0 : i32
    %c0_i32_1 = arith.constant 0 : i32
    return %c0_i32, %c0_i32_0 : i32, i32
  }
  func.func @transform_6(%arg0: i32) -> (i32, i32) {
    %c0_i32 = arith.constant 0 : i32
    %c0_i32_0 = arith.constant 0 : i32
    %c0_i32_1 = arith.constant 0 : i32
    return %c0_i32, %c0_i32_0 : i32, i32
  }
  func.func @transform_7(%arg0: i32) -> (i32, i32) {
    %c0_i32 = arith.constant 0 : i32
    %c0_i32_0 = arith.constant 0 : i32
    %c0_i32_1 = arith.constant 0 : i32
    return %c0_i32, %c0_i32_0 : i32, i32
  }
  func.func @transform_8(%arg0: i32) -> (i32, i32) {
    %c0_i32 = arith.constant 0 : i32
    %c0_i32_0 = arith.constant 0 : i32
    %c0_i32_1 = arith.constant 0 : i32
    return %c0_i32, %c0_i32_0 : i32, i32
  }
  func.func @transform_9(%arg0: i32) -> (i32, i32) {
    %c0_i32 = arith.constant 0 : i32
    %c0_i32_0 = arith.constant 0 : i32
    %c0_i32_1 = arith.constant 0 : i32
    return %c0_i32, %c0_i32_0 : i32, i32
  }
  func.func @transform_10(%arg0: i32) -> (i32, i32) {
    %c0_i32 = arith.constant 0 : i32
    %c0_i32_0 = arith.constant 0 : i32
    return %arg0, %c0_i32 : i32, i32
  }
}

</mosaic_0001>

<bundles_post_ra>
// kernel: mlp_forward_fused.1
= control target key start
LH: loop header
LB: loop body
LE: loop exit
PB: predicated region body
PF: predicated region fallthrough
CT: control target
= control target key end

     0   :  { %v537_v1 = vmov 0.0   ;;  %vm538_vm0 = vmmov 0   ;;  %vm60_vm1 = vcmask 261120   ;;  %s708_s0 = inlined_call_operand.vmem [shape: bf16[16,32], index: 0, kind: input, shape index: {}]   ;;  %s709_s1 = inlined_call_operand.vmem [shape: bf16[32,128], index: 1, kind: input, shape index: {}]   ;;  %s710_s2 = inlined_call_operand.vmem [shape: f32[1,128], index: 2, kind: input, shape index: {}]   ;;  %s711_s3 = inlined_call_operand.vmem [shape: f32[1,128], index: 3, kind: input, shape index: {}]   ;;  %s712_s4 = inlined_call_operand.vmem [shape: bf16[128,128], index: 4, kind: input, shape index: {}]   ;;  %s713_s5 = inlined_call_operand.vmem [shape: f32[1,128], index: 5, kind: input, shape index: {}]   ;;  %s714_s6 = inlined_call_operand.vmem [shape: f32[1,128], index: 6, kind: input, shape index: {}]   ;;  %s715_s7 = inlined_call_operand.vmem [shape: bf16[128,16], index: 7, kind: input, shape index: {}]   ;;  %s716_s8 = inlined_call_operand.vmem [shape: f32[1,16], index: 8, kind: input, shape index: {}]   ;;  %s717_s9 = inlined_call_operand.vmem [shape: f32[1,16], index: 9, kind: input, shape index: {}]   ;;  %s718_s10 = inlined_call_operand.hbm [shape: f32[16,16], index: 10, kind: output, shape index: {}]  }
   0x1   :  { %v494_v0 = vld [vmem:[%s709_s1] sm:$0xff]   ;;  %441 = vmatprep.subr.bf16.mxu0 %v537_v1  ;;  %449 = vmatprep.subr.bf16.mxu1 %v537_v1  ;;  %v495_v2 = vld [vmem:[%s709_s1 + $0x8] sm:$0xff]   ;;  %v499_v6 = vld [vmem:[%s712_s4 + $0x10] sm:$0xff]  }
   0x2   :  { %442 = vmatpush3.bf16.msra.mxu0 %v494_v0  ;;  %445 = vmatprep.mubr.msk.bf16.mxu0 %vm538_vm0, %v537_v1  ;;  %v497_v3 = vld [vmem:[%s712_s4] sm:$0xff]   ;;  %v498_v5 = vld [vmem:[%s712_s4 + $0x8] sm:$0xff]   ;;  %v500_v7 = vld [vmem:[%s712_s4 + $0x18] sm:$0xff]  }
   0x3   :  { %443 = vmatprep.subr.bf16.mxu0 %v537_v1  ;;  %465 = vmatprep.mubr.msk.bf16.mxu1 %vm538_vm0, %v537_v1  ;;  %v496_v4 = vld [vmem:[%s708_s0] sm:$0xff]  }
   0x4   :  { %450 = vmatpush3.bf16.msra.mxu1 %v497_v3 }
   0x5   :  { %451 = vmatprep.subr.bf16.mxu1 %v537_v1 }
   0x6   :  { %444 = vmatpush3.bf16.msra.mxu0 %v495_v2 }
   0x7   :  { %469 = vmatprep.subr.bf16.mxu0 %v537_v1 }
   0x8   :  { %452 = vmatpush3.bf16.msra.mxu1 %v498_v5 }
   0x9   :  { %446 = vmatmul.mubr.msk.bf16.vlgmr.msra.gmra.mrb[0].mxu0 %vm60_vm1, %v496_v4  ;;  %453 = vmatprep.subr.bf16.mxu1 %v537_v1 }
   0xa   :  { %485 = vmatprep.mubr.msk.bf16.mxu0 %vm538_vm0, %v537_v1 }
   0xc   :  { %454 = vmatpush3.bf16.msra.mxu1 %v499_v6 }
   0xd   :  { %455 = vmatprep.subr.bf16.mxu1 %v537_v1 }
   0xe   :  { %15 = vsyncpa [#allocation3], 0  ;;  %v501_v8 = vld [vmem:[%s712_s4 + $0x20] sm:$0xff]   ;;  %v502_v9 = vld [vmem:[%s712_s4 + $0x28] sm:$0xff]   ;;  %vm375_vm2 = vcmask 130048  }
   0xf   :  { %v503_v10 = vld [vmem:[%s712_s4 + $0x30] sm:$0xff]   ;;  %v504_v11 = vld [vmem:[%s712_s4 + $0x38] sm:$0xff]   ;;  %v505_v12 = vld [vmem:[%s715_s7] sm:$0xff]  }
  0x10   :  { %456 = vmatpush3.bf16.msra.mxu1 %v500_v7  ;;  %470 = vmatpush3.bf16.msra.mxu0 %v505_v12  ;;  %v506_v13 = vld [vmem:[%s715_s7 + $0x8] sm:$0xff]   ;;  %v507_v14 = vld [vmem:[%s715_s7 + $0x10] sm:$0xff]   ;;  %v508_v15 = vld [vmem:[%s715_s7 + $0x18] sm:$0xff]  }
  0x11   :  { %457 = vmatprep.subr.bf16.mxu1 %v537_v1  ;;  %471 = vmatprep.subr.bf16.mxu0 %v537_v1  ;;  %v509_v16 = vld [vmem:[%s715_s7 + $0x20] sm:$0xff]   ;;  %v510_v30 = vld [vmem:[%s715_s7 + $0x28] sm:$0xff]   ;;  %v511_v31 = vld [vmem:[%s715_s7 + $0x30] sm:$0xff]  }
  0x12   :  { %v398_v17 = vld [vmem:[%s710_s2] ss:$0 sm:$0xff]  ;;  %v512_v32 = vld [vmem:[%s715_s7 + $0x38] sm:$0xff]  }
  0x13   :  { %v399_v19 = vld [vmem:[%s711_s3] ss:$0 sm:$0xff] }
  0x14   :  { %458 = vmatpush3.bf16.msra.mxu1 %v501_v8  ;;  %472 = vmatpush3.bf16.msra.mxu0 %v506_v13  ;;  %v408_v33 = vld [vmem:[%s713_s5] ss:$0 sm:$0xff] }
  0x15   :  { %459 = vmatprep.subr.bf16.mxu1 %v537_v1  ;;  %473 = vmatprep.subr.bf16.mxu0 %v537_v1  ;;  %v409_v35 = vld [vmem:[%s714_s6] ss:$0 sm:$0xff]  ;;  %s539_s6 = smov [#allocation2]  }
  0x16   :  { %v418_v46 = vld [vmem:[%s716_s8] ss:$0 sm:$0xff]  ;;  %s383_s14 = sshll.u32 %s539_s6, 4  ;;  %s384_s14 = int_to_ptr.vmem [resolvable:$true] %s383_s14 }
  0x17   :  { %v419_v48 = vld [vmem:[%s717_s9] ss:$0 sm:$0xff]  ;;  %s513_s15 = scalar_lea.vmem %s384_s14, 256  ;;  %p518_p1 = scmp.lt.s32.totalorder %s384_s14, %s384_s14 }
  0x18   :  { %460 = vmatpush3.bf16.msra.mxu1 %v502_v9  ;;  %474 = vmatpush3.bf16.msra.mxu0 %v507_v14  ;;  %p514_p0 = scmp.ne.s32.totalorder %s384_s14, %s513_s15  ;;  %p519_p2 = scmp.lt.s32.totalorder %s513_s15, %s513_s15 }
  0x19   :  { %461 = vmatprep.subr.bf16.mxu1 %v537_v1  ;;  %475 = vmatprep.subr.bf16.mxu0 %v537_v1 }
  0x1a   :  { %p520_p3 = por %p519_p2, %p518_p1 }
  0x1c   :  { %462 = vmatpush3.bf16.msra.mxu1 %v503_v10  ;;  %476 = vmatpush3.bf16.msra.mxu0 %v508_v15  ;;  %p521_p4 = pnand %p520_p3, %p514_p0 }
  0x1d   :  { %463 = vmatprep.subr.bf16.mxu1 %v537_v1  ;;  %477 = vmatprep.subr.bf16.mxu0 %v537_v1 }
  0x20   :  { %464 = vmatpush3.bf16.msra.mxu1 %v504_v11  ;;  %478 = vmatpush3.bf16.msra.mxu0 %v509_v16 }
  0x21   :  { %479 = vmatprep.subr.bf16.mxu0 %v537_v1 }
  0x24   :  { %480 = vmatpush3.bf16.msra.mxu0 %v510_v30 }
  0x25   :  { %481 = vmatprep.subr.bf16.mxu0 %v537_v1 }
  0x28   :  { %482 = vmatpush3.bf16.msra.mxu0 %v511_v31 }
  0x29   :  { %483 = vmatprep.subr.bf16.mxu0 %v537_v1 }
  0x2c   :  { %484 = vmatpush3.bf16.msra.mxu0 %v512_v32 }
  0xdc   :  { %v98_v18 = vpop.f32.mrb[0].mxu0 }
  0xdd   :  { %v112_v20 = vmul.f32 %v398_v17, %v98_v18  ;;  %v447_v21 = vpop.f32.mrb[1].mxu0 }
  0xde   :  { %v101_v22 = vpop.f32.mrb[2].mxu0 }
  0xdf   :  { %v121_v23 = vadd.f32 %v399_v19, %v112_v20  ;;  %v113_v24 = vmul.f32 %v398_v17, %v101_v22  ;;  %v448_v25 = vpop.f32.mrb[3].mxu0 }
  0xe1   :  { %v122_v26 = vadd.f32 %v399_v19, %v113_v24  ;;  %v123_v27 = vmax.f32 %v121_v23, 0.0 }
  0xe3   :  { %v124_v28 = vmax.f32 %v122_v26, 0.0 }
  0xe5   :  { %v125_v29 = vpack.c.bf16 %v124_v28, %v123_v27 }
  0xe7   :  { %466 = vmatmul.mubr.bf16.vlgmr.msra.gmra.mrb[0].mxu1 %v125_v29 }
 0x1ba   :  { %v224_v34 = vpop.f32.mrb[0].mxu1 }
 0x1bb   :  { %v238_v36 = vmul.f32 %v408_v33, %v224_v34  ;;  %v467_v37 = vpop.f32.mrb[1].mxu1 }
 0x1bc   :  { %v227_v38 = vpop.f32.mrb[2].mxu1 }
 0x1bd   :  { %v247_v39 = vadd.f32 %v409_v35, %v238_v36  ;;  %v239_v40 = vmul.f32 %v408_v33, %v227_v38  ;;  %v468_v41 = vpop.f32.mrb[3].mxu1 }
 0x1bf   :  { %v248_v42 = vadd.f32 %v409_v35, %v239_v40  ;;  %v249_v43 = vmax.f32 %v247_v39, 0.0 }
 0x1c1   :  { %v250_v44 = vmax.f32 %v248_v42, 0.0 }
 0x1c3   :  { %v251_v45 = vpack.c.bf16 %v250_v44, %v249_v43 }
 0x1c5   :  { %486 = vmatmul.mubr.bf16.vlgmr.msra.gmra.mrb[4].mxu0 %v251_v45 }
 0x298   :  { %v350_v47 = vpop.f32.mrb[4].mxu0 }
 0x299   :  { %v364_v49 = vmul.f32 %v418_v46, %v350_v47  ;;  %v487_v50 = vpop.f32.mrb[5].mxu0 }
 0x29a   :  { %v353_v51 = vpop.f32.mrb[6].mxu0 }
 0x29b   :  { %v373_v52 = vadd.f32 %v419_v48, %v364_v49  ;;  %v365_v53 = vmul.f32 %v418_v46, %v353_v51  ;;  %v488_v54 = vpop.f32.mrb[7].mxu0 }
 0x29d   :  { %376 = vst.msk [vmem:[#allocation2] sm:$0xff] %vm375_vm2, %v373_v52  ;;  %v374_v55 = vadd.f32 %v419_v48, %v365_v53 }
 0x29f   :  { %377 = vst.msk [vmem:[#allocation2 + $0x8] sm:$0xff] %vm375_vm2, %v374_v55 }
 0x2a0   :  { %524 = shalt.err (!%p521_p4)
}
 0x2a1   :  { %s525_s16 = scalar_lea.hbm %s718_s10, 256 }
 0x2a2   :  { %p526_p5 = scmp.ne.s32.totalorder %s718_s10, %s525_s16  ;;  %p529_p6 = scmp.lt.u32.totalorder %s525_s16, %s718_s10 }
 0x2a4   :  { %p531_p7 = pnand %p529_p6, %p526_p5 }
 0x2a6   :  { %534 = shalt.err (!%p531_p7)
}
 0x2a7   :  { %s540_s20 = smov 128   ;;  %s541_s21 = smov 8  }
 0x2a8   :  { %389 = dma.vmem_to_hbm [thread:$0]  %s384_s14, 256, %s718_s10, [#allocation3], %s540_s20, %s540_s20, %s541_s21  }
 0x2a9   :  { %535 = dma.done.wait [#allocation3], 256  }
 0x2aa   :  { %536 = vsyncadd [#allocation3], 4294967040 }
 0x2ab   :  { %393 = vsyncpa [#allocation3], 1 }

</bundles_post_ra>
